<compile_context>
chip_gen: v7x
topology: tpu7x:2x2x1
jax: 0.10.0
libtpu: 0.0.40
codegen_flags: <defaults>
</compile_context>

<pallas_src>
import jax
import jax.numpy as jnp
from jax.experimental import pallas as pl
from jax.experimental.pallas import tpu as pltpu


def _round_up(x, m):
    return ((x + m - 1) // m) * m


def _round_down(x, m):
    return (x // m) * m


def _vmem_capacity_bytes():
    """Physical VMEM per TensorCore; conservatively 64 MiB (v7x) if unknown."""
    try:
        return int(pltpu.get_tpu_info().vmem_capacity_bytes)
    except Exception:
        return 64 * 1024 * 1024


def _kernel(x_ref, s_ref, o_ref):
    x = x_ref[...].astype(jnp.float32)            # (rb, cb)
    silu = jax.nn.sigmoid(x) * x                  # sigmoid(x) * ori  (EUP + VPU)
    s = s_ref[...].astype(jnp.float32)            # (rb, 1), lane-broadcast
    o_ref[...] = (silu * s).astype(o_ref.dtype)


def scaled_conv2d_silu(x_nchw, weight_c111):
    """x_nchw: (N, C, H, W); weight_c111: (C, 1, 1, 1) raw (pre-binarization)."""
    N, C, H, W = x_nchw.shape
    dtype = x_nchw.dtype

    # BinaryConv2d forward value: effective weight = (w > 0.5), 1x1 depthwise.
    binary_w = (weight_c111.reshape(C) > 0.5).astype(dtype)    # (C,)
    scale_rows = jnp.tile(binary_w, N).reshape(N * C, 1)       # (N*C, 1)

    rows, cols = N * C, H * W
    x2d = x_nchw.reshape(rows, cols)

    # ---- generation-aware tile caps -------------------------------------
    itemsize = jnp.dtype(dtype).itemsize
    sub = {4: 8, 2: 16, 1: 32}.get(itemsize, 8)    # dtype-aware sublane granule
    big_vmem = _vmem_capacity_bytes() >= 96 * 1024 * 1024   # v5e / v6e (128 MiB)
    row_cap = 512
    col_cap = 4096 if big_vmem else 2048           # 8 MiB vs 4 MiB f32 data tiles
    vmem_limit = (96 if big_vmem else 48) * 1024 * 1024

    # ---- fixed, granule-aligned blocks + cdiv grid (no pad, no slice) ----
    # Blocks never exceed the array dim: either the full (small) dim, or a
    # granule-aligned size <= dim; ragged edge blocks are masked by Pallas.
    rb = rows if rows < sub else min(row_cap, _round_down(rows, sub))
    cb = cols if cols < 128 else min(col_cap, _round_down(cols, 128))
    grid_r = pl.cdiv(rows, rb)
    grid_c = pl.cdiv(cols, cb)

    # v7x has 2 TensorCores sharing the parallel grid: never leave one idle
    # when the whole tensor fits in a single block.
    if not big_vmem and grid_r == 1 and grid_c == 1:
        if rows >= 2 * sub:
            rb = _round_up(pl.cdiv(rows, 2), sub)      # still <= rows, aligned
            grid_r = pl.cdiv(rows, rb)
        elif cols >= 2 * 128:
            cb = _round_up(pl.cdiv(cols, 2), 128)      # still <= cols, aligned
            grid_c = pl.cdiv(cols, cb)

    out2d = pl.pallas_call(
        _kernel,
        out_shape=jax.ShapeDtypeStruct((rows, cols), dtype),
        grid=(grid_r, grid_c),
        in_specs=[
            pl.BlockSpec((rb, cb), lambda i, j: (i, j)),
            pl.BlockSpec((rb, 1), lambda i, j: (i, 0)),
        ],
        out_specs=pl.BlockSpec((rb, cb), lambda i, j: (i, j)),
        compiler_params=pltpu.CompilerParams(
            dimension_semantics=("parallel", "parallel"),
            vmem_limit_bytes=vmem_limit,
        ),
    )(x2d, scale_rows)

    return out2d.reshape(N, C, H, W)


if __name__ == "__main__":
    key = jax.random.PRNGKey(0)
    kx, kw, kx2, kw2 = jax.random.split(key, 4)

    # Primary small test consistent with the module forward.
    N, C, H, W = 2, 4, 16, 16
    x = jax.random.normal(kx, (N, C, H, W), dtype=jnp.float32)
    # Module __init__ sets the weight to 1.0; draw in [0, 1) so the (w > 0.5)
    # binarization actually masks some channels.
    weight = jax.random.uniform(kw, (C, 1, 1, 1), dtype=jnp.float32)

    out = jax.block_until_ready(scaled_conv2d_silu(x, weight))
    w_eff = (weight.reshape(C) > 0.5).astype(jnp.float32).reshape(1, C, 1, 1)
    ref = jax.nn.sigmoid(x) * w_eff * x
    assert jnp.allclose(out, ref, atol=1e-6, rtol=1e-6)

    # Second shape: tiny dims below the (8,128) granules -> full-dim blocks.
    N2, C2, H2, W2 = 1, 3, 10, 10
    x2 = jax.random.normal(kx2, (N2, C2, H2, W2), dtype=jnp.float32)
    weight2 = jax.random.uniform(kw2, (C2, 1, 1, 1), dtype=jnp.float32)
    out2 = jax.block_until_ready(scaled_conv2d_silu(x2, weight2))
    w_eff2 = (weight2.reshape(C2) > 0.5).astype(jnp.float32).reshape(1, C2, 1, 1)
    ref2 = jax.nn.sigmoid(x2) * w_eff2 * x2
    assert jnp.allclose(out2, ref2, atol=1e-6, rtol=1e-6)

    # Third shape: non-aligned rows/cols exercising the masked cdiv edge blocks
    # (rows=10 not a multiple of 8, cols=576 not a multiple of the block).
    N3, C3, H3, W3 = 2, 5, 24, 24
    x3 = jax.random.normal(kx, (N3, C3, H3, W3), dtype=jnp.float32)
    weight3 = jax.random.uniform(kw, (C3, 1, 1, 1), dtype=jnp.float32)
    out3 = jax.block_until_ready(scaled_conv2d_silu(x3, weight3))
    w_eff3 = (weight3.reshape(C3) > 0.5).astype(jnp.float32).reshape(1, C3, 1, 1)
    ref3 = jax.nn.sigmoid(x3) * w_eff3 * x3
    assert jnp.allclose(out3, ref3, atol=1e-6, rtol=1e-6)

    print("KERNEL_OK")
</pallas_src>

<mosaic_0001>
module attributes {stable_mosaic.version = 11 : i64} {
  func.func @_kernel(%arg0: i32, %arg1: i32, %arg2: memref<8x128xf32, #tpu.memory_space<vmem>>, %arg3: memref<8x1xf32, #tpu.memory_space<vmem>>, %arg4: memref<8x128xf32, #tpu.memory_space<vmem>>) attributes {dimension_semantics = [#tpu.dimension_semantics<parallel>, #tpu.dimension_semantics<parallel>], iteration_bounds = array<i64: 1, 2>, scalar_prefetch = 0 : i64, scratch_operands = 0 : i64, tpu.core_type = #tpu.core_type<tc>, window_params = [{transform_indices = @transform_0, window_bounds = array<i64: 8, 128>}, {transform_indices = @transform_1, window_bounds = array<i64: 8, 1>}, {transform_indices = @transform_2, window_bounds = array<i64: 8, 128>}]} {
    %c0 = arith.constant 0 : index
    %c0_0 = arith.constant 0 : index
    %0 = vector.load %arg2[%c0, %c0_0] : memref<8x128xf32, #tpu.memory_space<vmem>>, vector<8x128xf32>
    %1 = arith.negf %0 : vector<8x128xf32>
    %2 = math.exp %1 : vector<8x128xf32>
    %cst = arith.constant 1.000000e+00 : f32
    %3 = vector.broadcast %cst : f32 to vector<8x128xf32>
    %4 = arith.addf %3, %2 : vector<8x128xf32>
    %5 = arith.divf %3, %4 : vector<8x128xf32>
    %6 = arith.mulf %5, %0 : vector<8x128xf32>
    %c0_1 = arith.constant 0 : index
    %c0_2 = arith.constant 0 : index
    %7 = vector.load %arg3[%c0_1, %c0_2] : memref<8x1xf32, #tpu.memory_space<vmem>>, vector<8x1xf32>
    %8 = vector.broadcast %7 : vector<8x1xf32> to vector<8x128xf32>
    %9 = arith.mulf %6, %8 : vector<8x128xf32>
    %c0_3 = arith.constant 0 : index
    %c0_4 = arith.constant 0 : index
    %10 = vector.load %arg4[%c0_3, %c0_4] : memref<8x128xf32, #tpu.memory_space<vmem>>, vector<8x128xf32>
    tpu.vector_store %arg4[%c0_3, %c0_4], %9 {strides = array<i32>} : memref<8x128xf32, #tpu.memory_space<vmem>>, vector<8x128xf32>,
    return
  }
  func.func @transform_0(%arg0: i32, %arg1: i32) -> (i32, i32) {
    %c0_i32 = arith.constant 0 : i32
    return %arg0, %arg1 : i32, i32
  }
  func.func @transform_1(%arg0: i32, %arg1: i32) -> (i32, i32) {
    %c0_i32 = arith.constant 0 : i32
    %c0_i32_0 = arith.constant 0 : i32
    return %arg0, %c0_i32 : i32, i32
  }
  func.func @transform_2(%arg0: i32, %arg1: i32) -> (i32, i32) {
    %c0_i32 = arith.constant 0 : i32
    return %arg0, %arg1 : i32, i32
  }
}

</mosaic_0001>

<bundles_post_ra>
// kernel: tpu_custom_call.1
= control target key start
LH: loop header
LB: loop body
LE: loop exit
PB: predicated region body
PF: predicated region fallthrough
CT: control target
= control target key end

     0   :  { %7 = vsyncpa [#allocation3], 0  ;;  %s713_s0 = inlined_call_operand.hbm [shape: f32[8,256], index: 0, kind: input, shape index: {}]   ;;  %s714_s1 = inlined_call_operand.vmem [shape: f32[8,1], index: 1, kind: input, shape index: {}]   ;;  %s715_s2 = inlined_call_operand.hbm [shape: f32[8,256], index: 2, kind: output, shape index: {}]  }
   0x1   :  { %9 = vsyncpa [#allocation3 + $0x1], 0 }
   0x2   :  { %10 = vsyncpa [#allocation4], 0 }
   0x3   :  { %12 = vsyncpa [#allocation4 + $0x1], 0  ;;  %s538_s9 = smov 0   ;;  %s540_s10 = smov 0  }
   0x4   :  { %s542_s11 = smov 0   ;;  %s544_s12 = smov 0  }
   0x5   :  { %s546_s13 = smov 0   ;;  %s548_s14 = smov 0  }
   0x6 LB: > { %s323_s15 = sadd.s32 4294967295, %s518_s14   ;;  %s324_s16 = sadd.s32 4294967294, %s518_s14   ;;  %s518_s14 = sphi %s548_s14, %s18_s14   ;;  %s514_s13 = sphi %s546_s13, %s731_s13   ;;  %s510_s12 = sphi %s544_s12, %s730_s12   ;;  %s506_s11 = sphi %s542_s11, %s729_s11   ;;  %s502_s10 = sphi %s540_s10, %s728_s10   ;;  %s498_s9 = sphi %s538_s9, %s727_s9  }
   0x7   : > { %s27_s17 = sadd.s32 1, %s514_s13  ;;  %s39_s18 = sadd.s32 1, %s506_s11 }
   0x8   : > { %p28_p0 = scmp.ge.s32.totalorder %s27_s17, 2  ;;  %p46_p1 = scmp.ne.s32.totalorder %s506_s11, %s502_s10 }
   0x9   : > { %p47_p2 = scmp.eq.s32.totalorder %s518_s14, 0  ;;  %p52_p3 = scmp.ne.s32.totalorder %s502_s10, %s498_s9 }
   0xa   : > { %s733_s17 = smov (%p28_p0, %s27_s17), 0  ;;  %p53_p5 = scmp.eq.s32.totalorder %s323_s15, 0 }
   0xb   : > { %p579_p4 = por %p47_p2, %p46_p1  ;;  %s35_s20 = ssub.s32 %s514_s13, %s733_s17 }
   0xc   : > { %p104_p6 = scmp.eq.s32.totalorder %s323_s15, 1  ;;  %p37_p7 = scmp.eq.s32.totalorder %s35_s20, 0 }
   0xd   : > { %p585_p8 = por %p53_p5, %p52_p3  ;;  %p110_p10 = scmp.eq.s32.totalorder %s324_s16, 1 }
   0xe   : > { %p589_p9 = por %p104_p6, %p46_p1  ;;  %p350_p13 = scmp.lt.s32.totalorder %s518_s14, 2 }
   0xf   : > { %s594_s23 = scalar_select %p37_p7, %s506_s11, %s39_s18  }
  0x10   : > { %s719_s22 = scalar_select %p589_p9, 1, 0 }
  0x11   : > { %p596_p11 = por %p110_p10, %p52_p3  ;;  %s137_s25 = sand.u32 1, %s506_s11  }
  0x12   : > { %s328_s26 = sshll.u32 %s137_s25, 3  ;;  %s329_s27 = sshll.u32 %s514_s13, 7 }
  0x13   : > { %s720_s24 = scalar_select %p596_p11, 1, 0 }
  0x14   : > { %s607_s30 = scalar_lea.hbm %s713_s0, %s329_s27  ;;  %s141_s3 = scalar_lea.vmem [#allocation2], %s328_s26 }
  0x15   : > { %s150_s4 = sshll.u32 %s141_s3, 4  ;;  %p613_p0 = pnand %p350_p13, %p579_p4  ;;  %s609_s4 = int_to_ptr.vmem [resolvable:$true] %s150_s4 }
  0x16   : > { %s138_s6 = scalar_lea.sflag [#allocation3], %s137_s25  ;;  %s406_s7 = scalar_lea.hbm %s607_s30, 128 }
  0x17   : > { %p407_p3 = scmp.ne.s32.totalorder %s607_s30, %s406_s7  ;;  %p408_p5 = pneg %p613_p0 }
  0x18   : > { %s411_s16 = scalar_lea.hbm %s713_s0, 256  ;;  %p412_p4 = scmp.lt.u32.totalorder %s607_s30, %s713_s0 }
  0x19   : > { %p409_p6 = pnand %p408_p5, %p407_p3  ;;  %p413_p10 = scmp.lt.u32.totalorder %s411_s16, %s406_s7 }
  0x1a   : > { %p415_p12 = scmp.lt.u32.totalorder %s406_s7, %s607_s30 }
  0x1b   : > { %p410_p7 = pneg %p409_p6  ;;  %p414_p13 = por %p413_p10, %p412_p4 }
  0x1d   : > { %p416_p1 = por %p415_p12, %p414_p13 }
  0x1f   : > { %p417_p2 = pnand %p416_p1, %p410_p7 }
  0x21   : > { %420 = shalt.err (!%p417_p2)
}
  0x22   : > { %s421_s20 = scalar_lea.vmem %s609_s4, 128  ;;  %s520_s25 = smov [#allocation2]  }
  0x23   : > { %p422_p3 = scmp.ne.s32.totalorder %s609_s4, %s421_s20  ;;  %s426_s26 = sshll.u32 %s520_s25, 4  ;;  %s427_s26 = int_to_ptr.vmem [resolvable:$false] %s426_s26 }
  0x24   : > { %s428_s27 = scalar_lea.vmem %s427_s26, 256  ;;  %p429_p9 = scmp.lt.s32.totalorder %s609_s4, %s427_s26 }
  0x25   : > { %p424_p6 = pnand %p422_p3, %p408_p5  ;;  %p430_p4 = scmp.lt.s32.totalorder %s428_s27, %s421_s20 }
  0x27   : > { %p425_p11 = pneg %p424_p6  ;;  %p431_p10 = por %p430_p4, %p429_p9 }
  0x29   : > { %p432_p12 = pnand %p431_p10, %p425_p11 }
  0x2b   : > { %435 = shalt.err (!%p432_p12)
}
  0x2c   : > { %345 = dma.hbm_to_vmem [thread:$0]  (!%p613_p0), %s607_s30, 128, %s609_s4, %s138_s6  }
  0x2d   : > { %p722_p1 = scmp.lt.s32.totalorder %s518_s14, 3  ;;  %p723_p2 = scmp.ge.s32.totalorder %s518_s14, 1 }
  0x2f   : > { %p156_p5 = pnand %p723_p2, %p722_p1 }
  0x30   : > { %s649_s28 = sand.u32 (!%p156_p5), 1, %s502_s10  }
  0x31   : > { %159 = sbr.rel (%p156_p5) target bundleno = 203 (0xcb), region = 28  ;;  %s331_s29 = sshll.u32 (!%p156_p5), %s649_s28, 3 }
  0x32   : > { %s162_s3 = scalar_lea.sflag (!%p156_p5), [#allocation3], %s649_s28  ;;  %s165_s7 = scalar_lea.vmem (!%p156_p5), [#allocation2], %s331_s29 }
  0x38   : > { %489 = dma.done.wait (%p585_p8), %s162_s3, 128  }
  0x39   : > { %491 = vsyncadd (%p585_p8), %s162_s3, 4294967168  ;;  %v521_v0 = vmov 0   ;;  %v202_v1 = vld [vmem:[%s714_s1] sm:$0xff]  ;;  %s335_s21 = sshll.u32 %s510_s12, 7  ;;  %s189_s5 = scalar_lea.vmem [#allocation5], %s331_s29 }
  0x3a   : > { %401 = vset.pattern.permute.xlu0 %v521_v0  ;;  %v194_v2 = vld [vmem:[%s165_s7] sm:$0xff]  ;;  %s226_s6 = sshll.u32 %s189_s5, 4  ;;  %s664_s16 = scalar_lea.hbm %s715_s2, %s335_s21  ;;  %s666_s6 = int_to_ptr.vmem [resolvable:$true] %s226_s6 }
  0x3b   : > { %205 = vperm.xlu0 %401, %v202_v1   ;;  %v333_v3 = vmul.f32 -1.442695, %v194_v2  ;;  %s211_s18 = scalar_lea.sflag [#allocation4], %s649_s28  ;;  %s436_s19 = scalar_lea.vmem %s666_s6, 128 }
  0x3c   : > { %p437_p8 = scmp.ne.s32.totalorder %s666_s6, %s436_s19  ;;  %p724_p9 = scmp.ne.s32.totalorder %s719_s22, 0 }
  0x3d   : > { %402 = vpow2.f32 %v333_v3  ;;  %s522_s12 = smov [#allocation5]  }
  0x3e   : > { %p438_p11 = pnand %p437_p8, %p724_p9  ;;  %s440_s20 = sshll.u32 %s522_s12, 4  ;;  %s441_s20 = int_to_ptr.vmem [resolvable:$false] %s440_s20 }
  0x3f   : > { %s442_s25 = scalar_lea.vmem %s441_s20, 256  ;;  %p443_p7 = scmp.lt.s32.totalorder %s666_s6, %s441_s20 }
  0x40   : > { %p439_p0 = pneg %p438_p11  ;;  %p444_p13 = scmp.lt.s32.totalorder %s442_s25, %s436_s19 }
  0x42   : > { %p445_p3 = por %p444_p13, %p443_p7 }
  0x44   : > { %p446_p6 = pnand %p445_p3, %p439_p0 }
  0x47   : > { %v403_v4 = vpop.eup %402 }
  0x48   : > { %v198_v5 = vadd.f32 1.0, %v403_v4 }
  0x4a   : > { %404 = vrcp.f32 %v198_v5 }
  0x54   : > { %v405_v6 = vpop.eup %404 }
  0x55   : > { %v201_v7 = vmul.f32 %v405_v6, %v194_v2 }
  0xba   : > { %v206_v8 = vpop.permute.xlu0 %205 }
  0xbb   : > { %v208_v9 = vmul.f32 %v206_v8, %v201_v7 }
  0xbd   : > { %209 = vst [vmem:[%s189_s5] sm:$0xff] %v208_v9 }
  0xbe   : > { %449 = shalt.err (!%p446_p6)
}
  0xbf   : > { %s450_s26 = scalar_lea.hbm %s664_s16, 128  ;;  %s454_s29 = scalar_lea.hbm %s715_s2, 256 }
  0xc0   : > { %p451_p4 = scmp.ne.s32.totalorder %s664_s16, %s450_s26  ;;  %p455_p1 = scmp.lt.u32.totalorder %s664_s16, %s715_s2 }
  0xc1   : > { %p456_p2 = scmp.lt.u32.totalorder %s454_s29, %s450_s26  ;;  %p458_p8 = scmp.lt.u32.totalorder %s450_s26, %s664_s16 }
  0xc2   : > { %p452_p10 = pnand %p451_p4, %p724_p9 }
  0xc3   : > { %p457_p5 = por %p456_p2, %p455_p1 }
  0xc4   : > { %p453_p12 = pneg %p452_p10 }
  0xc5   : > { %p459_p11 = por %p458_p8, %p457_p5 }
  0xc7   : > { %p460_p0 = pnand %p459_p11, %p453_p12 }
  0xc9   : > { %463 = shalt.err (!%p460_p0)
}
  0xca   : > { %340 = dma.vmem_to_hbm [thread:$0]  (%p724_p9), %s666_s6, 128, %s664_s16, %s211_s18  }
  0xcb PF: > { %s238_s30 = sand.u32 1, %s498_s9   ;;  %p725_p7 = scmp.ne.s32.totalorder %s720_s24, 0 }
  0xcc   : > { %p726_p13 = scmp.ge.s32.totalorder %s518_s14, 2  ;;  %s239_s4 = scalar_lea.sflag [#allocation4], %s238_s30 }
  0xce   : > { %p347_p3 = pnand %p726_p13, %p725_p7 }
  0xd0   : > { %493 = dma.done.wait (!%p347_p3), %s239_s4, 128  }
  0xd1   : > { %495 = vsyncadd (!%p347_p3), %s239_s4, 4294967168  ;;  %s18_s14 = sadd.s32 1, %s518_s14   ;;  %s727_s9 = smov %s502_s10 }
  0xd2   : > { %p15_p6 = scmp.ge.s32.totalorder %s18_s14, 4   ;;  %s728_s10 = smov %s506_s11 }
  0xd3   : > { %s729_s11 = smov %s594_s23  ;;  %s730_s12 = smov %s514_s13 }
  0xd4   : > { %s731_s13 = smov %s733_s17  ;;  %17 = sbr.rel (!%p15_p6) target bundleno = 6 (0x6), region = 76 }
  0xdb   :  { %244 = vsyncpa [#allocation3], 1 }
  0xdc   :  { %246 = vsyncpa [#allocation3 + $0x1], 1 }
  0xdd   :  { %247 = vsyncpa [#allocation4], 1 }
  0xde   :  { %249 = vsyncpa [#allocation4 + $0x1], 1 }

</bundles_post_ra>
